<compile_context>
chip_gen: v7x
topology: tpu7x:2x2x1
jax: 0.10.0
libtpu: 0.0.40
codegen_flags: <defaults>
</compile_context>

<pallas_src>
import functools

import jax
import jax.numpy as jnp
from jax.experimental import pallas as pl
from jax.experimental.pallas import tpu as pltpu

_LANE = 128
_VMEM_LIMIT_BYTES = 48 << 20      # safe scoped-VMEM budget across v5e/v6e/v7x
_TARGET_TILE_ELEMS = 1 << 20      # ~4 MiB f32 per buffered (N, TF) tile


def _round_up(x, m):
    return (x + m - 1) // m * m


def _pick_feature_tile(n_rows, num_features):
    """Largest lane-multiple feature tile keeping (N, TF) tiles VMEM-friendly."""
    f128 = _round_up(num_features, _LANE)
    tf = (_TARGET_TILE_ELEMS // max(n_rows, 1)) // _LANE * _LANE
    tf = max(tf, _LANE)
    return min(tf, 2048, f128)


# ----------------------------------------------------------------------------
# Training-mode kernel: per-feature batch mean/var + normalization.
# ----------------------------------------------------------------------------
def _bn_train_kernel(eps, unbiased_scale,
                     x_ref, gamma_ref, beta_ref,
                     y_ref, mean_ref, var_ref, var_eval_ref):
    x = x_ref[...]
    xf = x.astype(jnp.float32) if x.dtype != jnp.float32 else x
    n = xf.shape[0]
    inv_n = 1.0 / n
    mean = jnp.sum(xf, axis=0, keepdims=True) * inv_n            # (1, TF)
    diff = xf - mean
    var = jnp.sum(diff * diff, axis=0, keepdims=True) * inv_n    # biased
    inv_std = jax.lax.rsqrt(var + eps)
    y = gamma_ref[...] * (diff * inv_std) + beta_ref[...]
    y_ref[...] = y.astype(y_ref.dtype)
    mean_ref[...] = mean
    var_ref[...] = var
    var_eval_ref[...] = var * unbiased_scale                     # unbiased


def batchnorm1d_train(x, gamma, beta, moving_mean, moving_var, moving_var_eval,
                      eps=1e-5, momentum=0.1):
    """Training-mode forward (grad enabled in PyTorch).

    Returns (y, new_moving_mean, new_moving_var, new_moving_var_eval).
    """
    N, F = x.shape
    tf = _pick_feature_tile(N, F)
    f_pad = _round_up(F, tf)
    pad = f_pad - F

    if pad:
        x_p = jnp.pad(x, ((0, 0), (0, pad)))
        gamma_p = jnp.pad(gamma, ((0, 0), (0, pad)))
        beta_p = jnp.pad(beta, ((0, 0), (0, pad)))
    else:
        x_p, gamma_p, beta_p = x, gamma, beta

    grid = (f_pad // tf,)
    row_spec = pl.BlockSpec((N, tf), lambda j: (0, j))
    vec_spec = pl.BlockSpec((1, tf), lambda j: (0, j))

    # N=1 would be NaN in PyTorch's unbiased variance; clamp to avoid div-by-0.
    unbiased_scale = float(N) / float(max(N - 1, 1))
    kernel = functools.partial(_bn_train_kernel, float(eps), unbiased_scale)

    y, bmean, bvar, bvar_eval = pl.pallas_call(
        kernel,
        grid=grid,
        out_shape=(
            jax.ShapeDtypeStruct((N, f_pad), x.dtype),
            jax.ShapeDtypeStruct((1, f_pad), jnp.float32),
            jax.ShapeDtypeStruct((1, f_pad), jnp.float32),
            jax.ShapeDtypeStruct((1, f_pad), jnp.float32),
        ),
        in_specs=[row_spec, vec_spec, vec_spec],
        out_specs=(row_spec, vec_spec, vec_spec, vec_spec),
        compiler_params=pltpu.CompilerParams(
            dimension_semantics=("parallel",),
            vmem_limit_bytes=_VMEM_LIMIT_BYTES),
    )(x_p, gamma_p, beta_p)

    if pad:
        y = y[:, :F]
        bmean = bmean[:, :F]
        bvar = bvar[:, :F]
        bvar_eval = bvar_eval[:, :F]

    # Moving-average EMA updates are tiny (1, F) ops; keep them in plain JAX.
    new_mm = (1.0 - momentum) * moving_mean + momentum * bmean
    new_mv = (1.0 - momentum) * moving_var + momentum * bvar
    new_mve = (1.0 - momentum) * moving_var_eval + momentum * bvar_eval
    return y, new_mm, new_mv, new_mve


# ----------------------------------------------------------------------------
# Eval-mode kernel: y = x * scale + shift (scale/shift prefolded in JAX).
# ----------------------------------------------------------------------------
def _bn_eval_kernel(x_ref, scale_ref, shift_ref, y_ref):
    x = x_ref[...]
    xf = x.astype(jnp.float32) if x.dtype != jnp.float32 else x
    y_ref[...] = (xf * scale_ref[...] + shift_ref[...]).astype(y_ref.dtype)


def batchnorm1d_eval(x, gamma, beta, moving_mean, moving_var_eval, eps=1e-5):
    """Eval-mode forward (grad disabled in PyTorch)."""
    N, F = x.shape
    # Fold params + moving stats into a single per-feature scale/shift.
    scale = (gamma.astype(jnp.float32)
             * jax.lax.rsqrt(moving_var_eval.astype(jnp.float32) + eps))
    shift = beta.astype(jnp.float32) - moving_mean.astype(jnp.float32) * scale

    tf = _pick_feature_tile(N, F)
    f_pad = _round_up(F, tf)
    pad = f_pad - F

    if pad:
        x_p = jnp.pad(x, ((0, 0), (0, pad)))
        scale_p = jnp.pad(scale, ((0, 0), (0, pad)))
        shift_p = jnp.pad(shift, ((0, 0), (0, pad)))
    else:
        x_p, scale_p, shift_p = x, scale, shift

    grid = (f_pad // tf,)
    row_spec = pl.BlockSpec((N, tf), lambda j: (0, j))
    vec_spec = pl.BlockSpec((1, tf), lambda j: (0, j))

    y = pl.pallas_call(
        _bn_eval_kernel,
        grid=grid,
        out_shape=jax.ShapeDtypeStruct((N, f_pad), x.dtype),
        in_specs=[row_spec, vec_spec, vec_spec],
        out_specs=row_spec,
        compiler_params=pltpu.CompilerParams(
            dimension_semantics=("parallel",),
            vmem_limit_bytes=_VMEM_LIMIT_BYTES),
    )(x_p, scale_p, shift_p)

    return y[:, :F] if pad else y


if __name__ == "__main__":
    key = jax.random.PRNGKey(0)
    N, F = 8, 32
    x = jax.random.normal(key, (N, F), dtype=jnp.float32) * 2.0 + 0.5

    # Deterministic parameter init, matching nn.Module __init__ shapes (1, F).
    gamma = jnp.ones((1, F), jnp.float32)
    beta = jnp.zeros((1, F), jnp.float32)
    moving_mean = jnp.zeros((1, F), jnp.float32)
    moving_var = jnp.ones((1, F), jnp.float32)
    moving_var_eval = jnp.ones((1, F), jnp.float32)
    eps, momentum = 1e-5, 0.1

    # Training-mode forward.
    y, mm, mv, mve = batchnorm1d_train(
        x, gamma, beta, moving_mean, moving_var, moving_var_eval,
        eps=eps, momentum=momentum)
    jax.block_until_ready((y, mm, mv, mve))

    # Reference check (plain JAX) for the training-mode output + running stats.
    bmean = jnp.mean(x, axis=0, keepdims=True)
    bvar = jnp.var(x, axis=0, keepdims=True)            # biased
    bvar_eval = jnp.var(x, axis=0, ddof=1, keepdims=True)  # unbiased
    y_ref = gamma * ((x - bmean) / jnp.sqrt(bvar + eps)) + beta
    assert jnp.allclose(y, y_ref, atol=1e-5, rtol=1e-5)
    assert jnp.allclose(mm, (1 - momentum) * moving_mean + momentum * bmean,
                        atol=1e-6, rtol=1e-6)
    assert jnp.allclose(mv, (1 - momentum) * moving_var + momentum * bvar,
                        atol=1e-6, rtol=1e-6)
    assert jnp.allclose(mve, (1 - momentum) * moving_var_eval + momentum * bvar_eval,
                        atol=1e-6, rtol=1e-6)

    # Eval-mode forward with the updated running stats.
    y_eval = batchnorm1d_eval(x, gamma, beta, mm, mve, eps=eps)
    jax.block_until_ready(y_eval)
    y_eval_ref = gamma * ((x - mm) / jnp.sqrt(mve + eps)) + beta
    assert jnp.allclose(y_eval, y_eval_ref, atol=1e-5, rtol=1e-5)

    print("KERNEL_OK")
</pallas_src>

<mosaic_0001>
module attributes {stable_mosaic.version = 11 : i64} {
  func.func @_bn_train_kernel(%arg0: i32, %arg1: memref<8x128xf32, #tpu.memory_space<vmem>>, %arg2: memref<1x128xf32, #tpu.memory_space<vmem>>, %arg3: memref<1x128xf32, #tpu.memory_space<vmem>>, %arg4: memref<8x128xf32, #tpu.memory_space<vmem>>, %arg5: memref<1x128xf32, #tpu.memory_space<vmem>>, %arg6: memref<1x128xf32, #tpu.memory_space<vmem>>, %arg7: memref<1x128xf32, #tpu.memory_space<vmem>>) attributes {dimension_semantics = [#tpu.dimension_semantics<parallel>], iteration_bounds = array<i64: 1>, scalar_prefetch = 0 : i64, scratch_operands = 0 : i64, tpu.core_type = #tpu.core_type<tc>, window_params = [{transform_indices = @transform_0, window_bounds = array<i64: 8, 128>}, {transform_indices = @transform_1, window_bounds = array<i64: 1, 128>}, {transform_indices = @transform_2, window_bounds = array<i64: 1, 128>}, {transform_indices = @transform_3, window_bounds = array<i64: 8, 128>}, {transform_indices = @transform_4, window_bounds = array<i64: 1, 128>}, {transform_indices = @transform_5, window_bounds = array<i64: 1, 128>}, {transform_indices = @transform_6, window_bounds = array<i64: 1, 128>}]} {
    %c0 = arith.constant 0 : index
    %c0_0 = arith.constant 0 : index
    %0 = vector.load %arg1[%c0, %c0_0] : memref<8x128xf32, #tpu.memory_space<vmem>>, vector<8x128xf32>
    %cst = arith.constant dense<0.000000e+00> : vector<128xf32>
    %1 = vector.multi_reduction <add>, %0, %cst [0] : vector<8x128xf32> to vector<128xf32>
    %2 = vector.shape_cast %1 : vector<128xf32> to vector<1x128xf32>
    %cst_1 = arith.constant 1.250000e-01 : f32
    %3 = vector.broadcast %cst_1 : f32 to vector<1x128xf32>
    %4 = arith.mulf %2, %3 : vector<1x128xf32>
    %5 = vector.broadcast %4 : vector<1x128xf32> to vector<8x128xf32>
    %6 = arith.subf %0, %5 : vector<8x128xf32>
    %7 = arith.mulf %6, %6 : vector<8x128xf32>
    %cst_2 = arith.constant dense<0.000000e+00> : vector<128xf32>
    %8 = vector.multi_reduction <add>, %7, %cst_2 [0] : vector<8x128xf32> to vector<128xf32>
    %9 = vector.shape_cast %8 : vector<128xf32> to vector<1x128xf32>
    %cst_3 = arith.constant 1.250000e-01 : f32
    %10 = vector.broadcast %cst_3 : f32 to vector<1x128xf32>
    %11 = arith.mulf %9, %10 : vector<1x128xf32>
    %cst_4 = arith.constant 9.99999974E-6 : f32
    %12 = vector.broadcast %cst_4 : f32 to vector<1x128xf32>
    %13 = arith.addf %11, %12 : vector<1x128xf32>
    %14 = math.rsqrt %13 : vector<1x128xf32>
    %c0_5 = arith.constant 0 : index
    %c0_6 = arith.constant 0 : index
    %15 = vector.load %arg2[%c0_5, %c0_6] : memref<1x128xf32, #tpu.memory_space<vmem>>, vector<1x128xf32>
    %16 = vector.broadcast %14 : vector<1x128xf32> to vector<8x128xf32>
    %17 = arith.mulf %6, %16 : vector<8x128xf32>
    %18 = vector.broadcast %15 : vector<1x128xf32> to vector<8x128xf32>
    %19 = arith.mulf %18, %17 : vector<8x128xf32>
    %c0_7 = arith.constant 0 : index
    %c0_8 = arith.constant 0 : index
    %20 = vector.load %arg3[%c0_7, %c0_8] : memref<1x128xf32, #tpu.memory_space<vmem>>, vector<1x128xf32>
    %21 = vector.broadcast %20 : vector<1x128xf32> to vector<8x128xf32>
    %22 = arith.addf %19, %21 : vector<8x128xf32>
    %c0_9 = arith.constant 0 : index
    %c0_10 = arith.constant 0 : index
    %23 = vector.load %arg4[%c0_9, %c0_10] : memref<8x128xf32, #tpu.memory_space<vmem>>, vector<8x128xf32>
    tpu.vector_store %arg4[%c0_9, %c0_10], %22 {strides = array<i32>} : memref<8x128xf32, #tpu.memory_space<vmem>>, vector<8x128xf32>,
    %c0_11 = arith.constant 0 : index
    %c0_12 = arith.constant 0 : index
    %24 = vector.load %arg5[%c0_11, %c0_12] : memref<1x128xf32, #tpu.memory_space<vmem>>, vector<1x128xf32>
    tpu.vector_store %arg5[%c0_11, %c0_12], %4 {strides = array<i32>} : memref<1x128xf32, #tpu.memory_space<vmem>>, vector<1x128xf32>,
    %c0_13 = arith.constant 0 : index
    %c0_14 = arith.constant 0 : index
    %25 = vector.load %arg6[%c0_13, %c0_14] : memref<1x128xf32, #tpu.memory_space<vmem>>, vector<1x128xf32>
    tpu.vector_store %arg6[%c0_13, %c0_14], %11 {strides = array<i32>} : memref<1x128xf32, #tpu.memory_space<vmem>>, vector<1x128xf32>,
    %cst_15 = arith.constant 1.14285719 : f32
    %26 = vector.broadcast %cst_15 : f32 to vector<1x128xf32>
    %27 = arith.mulf %11, %26 : vector<1x128xf32>
    %c0_16 = arith.constant 0 : index
    %c0_17 = arith.constant 0 : index
    %28 = vector.load %arg7[%c0_16, %c0_17] : memref<1x128xf32, #tpu.memory_space<vmem>>, vector<1x128xf32>
    tpu.vector_store %arg7[%c0_16, %c0_17], %27 {strides = array<i32>} : memref<1x128xf32, #tpu.memory_space<vmem>>, vector<1x128xf32>,
    return
  }
  func.func @transform_0(%arg0: i32) -> (i32, i32) {
    %c0_i32 = arith.constant 0 : i32
    %c0_i32_0 = arith.constant 0 : i32
    return %c0_i32, %arg0 : i32, i32
  }
  func.func @transform_1(%arg0: i32) -> (i32, i32) {
    %c0_i32 = arith.constant 0 : i32
    %c0_i32_0 = arith.constant 0 : i32
    return %c0_i32, %arg0 : i32, i32
  }
  func.func @transform_2(%arg0: i32) -> (i32, i32) {
    %c0_i32 = arith.constant 0 : i32
    %c0_i32_0 = arith.constant 0 : i32
    return %c0_i32, %arg0 : i32, i32
  }
  func.func @transform_3(%arg0: i32) -> (i32, i32) {
    %c0_i32 = arith.constant 0 : i32
    %c0_i32_0 = arith.constant 0 : i32
    return %c0_i32, %arg0 : i32, i32
  }
  func.func @transform_4(%arg0: i32) -> (i32, i32) {
    %c0_i32 = arith.constant 0 : i32
    %c0_i32_0 = arith.constant 0 : i32
    return %c0_i32, %arg0 : i32, i32
  }
  func.func @transform_5(%arg0: i32) -> (i32, i32) {
    %c0_i32 = arith.constant 0 : i32
    %c0_i32_0 = arith.constant 0 : i32
    return %c0_i32, %arg0 : i32, i32
  }
  func.func @transform_6(%arg0: i32) -> (i32, i32) {
    %c0_i32 = arith.constant 0 : i32
    %c0_i32_0 = arith.constant 0 : i32
    return %c0_i32, %arg0 : i32, i32
  }
}

</mosaic_0001>

<bundles_post_ra>
// kernel: tpu_custom_call.1
= control target key start
LH: loop header
LB: loop body
LE: loop exit
PB: predicated region body
PF: predicated region fallthrough
CT: control target
= control target key end

     0   :  { %12 = vsyncpa [#allocation3], 0  ;;  %s376_s0 = inlined_call_operand.hbm [shape: f32[8,128], index: 0, kind: input, shape index: {}]   ;;  %s377_s1 = inlined_call_operand.vmem [shape: f32[1,128], index: 1, kind: input, shape index: {}]   ;;  %s378_s2 = inlined_call_operand.vmem [shape: f32[1,128], index: 2, kind: input, shape index: {}]   ;;  %s379_s3 = inlined_call_operand.hbm [shape: f32[8,128], index: 3, kind: output, shape index: {0}]   ;;  %s380_s4 = inlined_call_operand.hbm [shape: f32[1,128], index: 4, kind: output, shape index: {1}]   ;;  %s381_s5 = inlined_call_operand.hbm [shape: f32[1,128], index: 5, kind: output, shape index: {2}]   ;;  %s382_s6 = inlined_call_operand.hbm [shape: f32[1,128], index: 6, kind: output, shape index: {3}]  }
   0x1   :  { %13 = vsyncpa [#allocation4], 0 }
   0x2   :  { %14 = vsyncpa [#allocation7], 0 }
   0x3   :  { %15 = vsyncpa [#allocation10], 0  ;;  %s257_s21 = smov [#allocation2]   ;;  %s139_s25 = scalar_lea.hbm %s376_s0, 128 }
   0x4   :  { %s22_s22 = sshll.u32 %s257_s21, 4  ;;  %p140_p0 = scmp.ne.s32.totalorder %s376_s0, %s139_s25  ;;  %s23_s22 = int_to_ptr.vmem [resolvable:$true] %s22_s22 }
   0x5   :  { %p143_p1 = scmp.lt.u32.totalorder %s139_s25, %s376_s0 }
   0x7   :  { %p145_p2 = pnand %p143_p1, %p140_p0 }
   0x9   :  { %148 = shalt.err (!%p145_p2)
}
   0xa   :  { %s149_s30 = scalar_lea.vmem %s23_s22, 128  ;;  %p154_p4 = scmp.lt.s32.totalorder %s23_s22, %s23_s22 }
   0xb   :  { %p150_p3 = scmp.ne.s32.totalorder %s23_s22, %s149_s30  ;;  %p155_p5 = scmp.lt.s32.totalorder %s149_s30, %s149_s30 }
   0xd   :  { %p156_p6 = por %p155_p5, %p154_p4 }
   0xf   :  { %p157_p7 = pnand %p156_p6, %p150_p3 }
  0x11   :  { %160 = shalt.err (!%p157_p7)
}
  0x12   :  { %25 = dma.hbm_to_vmem [thread:$0]  %s376_s0, 128, %s23_s22, [#allocation3]  }
  0x13   :  { %249 = dma.done.wait [#allocation3], 128  }
  0x14   :  { %250 = vsyncadd [#allocation3], 4294967168  ;;  %v33_v0 = vld [vmem:[#allocation2] sm:$0xff]  ;;  %s258_s9 = smov [#allocation6]  }
  0x15   :  { %v34_v1 = vrot.slane %v33_v0, 4  ;;  %s90_s10 = sshll.u32 %s258_s9, 4  ;;  %s91_s10 = int_to_ptr.vmem [resolvable:$true] %s90_s10 }
  0x16   :  { %s161_s11 = scalar_lea.vmem %s91_s10, 16  ;;  %s165_s12 = scalar_lea.vmem %s91_s10, 32 }
  0x17   :  { %v35_v2 = vadd.f32 %v34_v1, %v33_v0  ;;  %p162_p8 = scmp.ne.s32.totalorder %s91_s10, %s161_s11  ;;  %p166_p9 = scmp.lt.s32.totalorder %s91_s10, %s91_s10 }
  0x18   :  { %p167_p10 = scmp.lt.s32.totalorder %s165_s12, %s161_s11 }
  0x19   :  { %v36_v3 = vrot.slane %v35_v2, 2 }
  0x1a   :  { %p168_p11 = por %p167_p10, %p166_p9 }
  0x1b   :  { %v37_v4 = vadd.f32 %v36_v3, %v35_v2 }
  0x1c   :  { %p169_p12 = pnand %p168_p11, %p162_p8 }
  0x1d   :  { %v38_v5 = vrot.slane %v37_v4, 1 }
  0x1f   :  { %v39_v6 = vadd.f32 %v38_v5, %v37_v4 }
  0x21   :  { %v40_v7 = vmul.f32 0.125, %v39_v6 }
  0x23   :  { %v309_v8 = vsub.f32 %v33_v0, %v40_v7  ;;  %70 = vst [vmem:[#allocation6] sm:$0x1] %v40_v7 }
  0x24   :  { %172 = shalt.err (!%p169_p12)
}
  0x25   :  { %s173_s14 = scalar_lea.hbm %s380_s4, 16 }
  0x26   :  { %p174_p13 = scmp.ne.s32.totalorder %s380_s4, %s173_s14  ;;  %p177_p0 = scmp.lt.u32.totalorder %s173_s14, %s380_s4 }
  0x28   :  { %p179_p1 = pnand %p177_p0, %p174_p13 }
  0x2a   :  { %182 = shalt.err (!%p179_p1)
}
  0x2b   :  { %93 = dma.vmem_to_hbm [thread:$0]  %s91_s10, 16, %s380_s4, [#allocation7]   ;;  %v42_v9 = vmul.f32 %v309_v8, %v309_v8 }
  0x2c   :  { %s259_s21 = smov [#allocation8]   ;;  %s260_s23 = smov [#allocation9]  }
  0x2d   :  { %v43_v10 = vrot.slane %v42_v9, 4  ;;  %s100_s22 = sshll.u32 %s259_s21, 4  ;;  %s110_s24 = sshll.u32 %s260_s23, 4  ;;  %s101_s22 = int_to_ptr.vmem [resolvable:$true] %s100_s22  ;;  %s325_s24 = int_to_ptr.vmem [resolvable:$true] %s110_s24 }
  0x2e   :  { %s183_s4 = scalar_lea.vmem %s101_s22, 16  ;;  %s187_s25 = scalar_lea.vmem %s101_s22, 32 }
  0x2f   :  { %v44_v11 = vadd.f32 %v43_v10, %v42_v9  ;;  %p184_p2 = scmp.ne.s32.totalorder %s101_s22, %s183_s4  ;;  %p188_p3 = scmp.lt.s32.totalorder %s101_s22, %s101_s22 }
  0x30   :  { %p189_p4 = scmp.lt.s32.totalorder %s187_s25, %s183_s4 }
  0x31   :  { %v45_v12 = vrot.slane %v44_v11, 2 }
  0x32   :  { %p190_p5 = por %p189_p4, %p188_p3 }
  0x33   :  { %v46_v13 = vadd.f32 %v45_v12, %v44_v11 }
  0x34   :  { %p191_p6 = pnand %p190_p5, %p184_p2 }
  0x35   :  { %v47_v14 = vrot.slane %v46_v13, 1 }
  0x37   :  { %v48_v15 = vadd.f32 %v47_v14, %v46_v13 }
  0x39   :  { %v49_v16 = vmul.f32 0.125, %v48_v15 }
  0x3b   :  { %v50_v17 = vadd.f32 1e-05, %v49_v16  ;;  %71 = vst [vmem:[#allocation8] sm:$0x1] %v49_v16  ;;  %v72_v18 = vmul.f32 1.1428572, %v49_v16 }
  0x3c   :  { %194 = shalt.err (!%p191_p6)
}
  0x3d   :  { %s195_s28 = scalar_lea.hbm %s381_s5, 16 }
  0x3e   :  { %p196_p7 = scmp.ne.s32.totalorder %s381_s5, %s195_s28  ;;  %p199_p8 = scmp.lt.u32.totalorder %s195_s28, %s381_s5 }
  0x40   :  { %p201_p9 = pnand %p199_p8, %p196_p7 }
  0x42   :  { %204 = shalt.err (!%p201_p9)
}
  0x43   :  { %103 = dma.vmem_to_hbm [thread:$0]  %s101_s22, 16, %s381_s5, [#allocation7]   ;;  %137 = vrsqrt.f32 %v50_v17  ;;  %73 = vst [vmem:[#allocation9] sm:$0x1] %v72_v18 }
  0x44   :  { %s205_s11 = scalar_lea.vmem %s325_s24, 16  ;;  %s209_s12 = scalar_lea.vmem %s325_s24, 32 }
  0x45   :  { %p206_p10 = scmp.ne.s32.totalorder %s325_s24, %s205_s11  ;;  %p210_p11 = scmp.lt.s32.totalorder %s325_s24, %s325_s24 }
  0x46   :  { %p211_p12 = scmp.lt.s32.totalorder %s209_s12, %s205_s11 }
  0x48   :  { %p212_p13 = por %p211_p12, %p210_p11 }
  0x4a   :  { %p213_p0 = pnand %p212_p13, %p206_p10 }
  0x4c   :  { %216 = shalt.err (!%p213_p0)
}
  0x4d   :  { %s217_s14 = scalar_lea.hbm %s382_s6, 16 }
  0x4e   :  { %p218_p1 = scmp.ne.s32.totalorder %s382_s6, %s217_s14  ;;  %p221_p2 = scmp.lt.u32.totalorder %s217_s14, %s382_s6 }
  0x50   :  { %p223_p3 = pnand %p221_p2, %p218_p1 }
  0x52   :  { %226 = shalt.err (!%p223_p3)
}
  0x53   :  { %113 = dma.vmem_to_hbm [thread:$0]  %s325_s24, 16, %s382_s6, [#allocation10]   ;;  %v138_v19 = vpop.eup %137  ;;  %v130_v20 = vld [vmem:[%s377_s1] ss:$0 sm:$0xff] }
  0x54   :  { %v53_v21 = vmul.f32 %v138_v19, %v309_v8  ;;  %v131_v22 = vld [vmem:[%s378_s2] ss:$0 sm:$0xff]  ;;  %s261_s4 = smov [#allocation5]  }
  0x55   :  { %s80_s25 = sshll.u32 %s261_s4, 4  ;;  %s81_s25 = int_to_ptr.vmem [resolvable:$true] %s80_s25 }
  0x56   :  { %v60_v23 = vmul.f32 %v130_v20, %v53_v21  ;;  %s227_s26 = scalar_lea.vmem %s81_s25, 128  ;;  %p232_p5 = scmp.lt.s32.totalorder %s81_s25, %s81_s25 }
  0x57   :  { %p228_p4 = scmp.ne.s32.totalorder %s81_s25, %s227_s26  ;;  %p233_p6 = scmp.lt.s32.totalorder %s227_s26, %s227_s26 }
  0x58   :  { %v68_v24 = vadd.f32 %v131_v22, %v60_v23 }
  0x59   :  { %p234_p7 = por %p233_p6, %p232_p5 }
  0x5a   :  { %69 = vst [vmem:[#allocation5] sm:$0xff] %v68_v24 }
  0x5b   :  { %p235_p8 = pnand %p234_p7, %p228_p4 }
  0x5d   :  { %238 = shalt.err (!%p235_p8)
}
  0x5e   :  { %s239_s24 = scalar_lea.hbm %s379_s3, 128 }
  0x5f   :  { %p240_p9 = scmp.ne.s32.totalorder %s379_s3, %s239_s24  ;;  %p243_p10 = scmp.lt.u32.totalorder %s239_s24, %s379_s3 }
  0x61   :  { %p245_p11 = pnand %p243_p10, %p240_p9 }
  0x63   :  { %248 = shalt.err (!%p245_p11)
}
  0x64   :  { %83 = dma.vmem_to_hbm [thread:$0]  %s81_s25, 128, %s379_s3, [#allocation4]  }
  0x65   :  { %251 = dma.done.wait [#allocation4], 128  }
  0x66   :  { %252 = vsyncadd [#allocation4], 4294967168 }
  0x67   :  { %253 = dma.done.wait [#allocation7], 32  }
  0x68   :  { %254 = vsyncadd [#allocation7], 4294967264 }
  0x69   :  { %255 = dma.done.wait [#allocation10], 16  }
  0x6a   :  { %256 = vsyncadd [#allocation10], 4294967280 }
  0x6b   :  { %126 = vsyncpa [#allocation3], 1 }
  0x6c   :  { %127 = vsyncpa [#allocation4], 1 }
  0x6d   :  { %128 = vsyncpa [#allocation7], 1 }
  0x6e   :  { %129 = vsyncpa [#allocation10], 1 }

</bundles_post_ra>
